<compile_context>
chip_gen: v6e
topology: v6e:2x2x1
jax: 0.10.0
libtpu: 0.0.40
codegen_flags: <defaults>
</compile_context>

<pallas_src>
import jax
import jax.numpy as jnp
from jax.experimental import pallas as pl
from jax.experimental.pallas import tpu as pltpu


# Parameter layout in the flat SMEM vector (f32[27]):
#   layers 1..4 (2->2): [w00, w01, w10, w11, b0, b1]  -> 6 scalars each
#   layer  5    (2->1): [w00, w10, b0]                -> 3 scalars
# where w[i, o] multiplies input feature i into output feature o.


def mlp_kernel(p_ref, x_ref, out_ref):
    # p_ref:   SMEM f32[27]       (all weights + biases as scalars)
    # x_ref:   VMEM f32[2,  T]    (input features on sublanes, batch on lanes)
    # out_ref: VMEM f32[18, T]    (all 10 features stacked on sublanes)
    h0 = x_ref[0:1, :]
    h1 = x_ref[1:2, :]

    def dense2(a0, a1, base):
        w00 = p_ref[base + 0]
        w01 = p_ref[base + 1]
        w10 = p_ref[base + 2]
        w11 = p_ref[base + 3]
        b0 = p_ref[base + 4]
        b1 = p_ref[base + 5]
        z0 = a0 * w00 + a1 * w10 + b0
        z1 = a0 * w01 + a1 * w11 + b1
        return z0, z1

    row = 0
    for layer in range(4):                      # tiny static unroll
        z0, z1 = dense2(h0, h1, layer * 6)
        out_ref[row + 0:row + 1, :] = z0
        out_ref[row + 1:row + 2, :] = z1
        h0 = jax.nn.sigmoid(z0)                 # EUP logistic
        h1 = jax.nn.sigmoid(z1)
        out_ref[row + 2:row + 3, :] = h0
        out_ref[row + 3:row + 4, :] = h1
        row += 4

    # final layer: 2 -> 1
    w0 = p_ref[24]
    w1 = p_ref[25]
    b = p_ref[26]
    z = h0 * w0 + h1 * w1 + b
    out_ref[16:17, :] = z
    out_ref[17:18, :] = jax.nn.sigmoid(z)


def pack_params(params):
    """Flatten [(W[in,out], b[out])...] into a single f32[27] vector."""
    flat = []
    for (w, b) in params:
        flat.append(jnp.asarray(w, jnp.float32).reshape(-1))   # row-major: w00,w01,w10,w11
        flat.append(jnp.asarray(b, jnp.float32).reshape(-1))
    return jnp.concatenate(flat)


# sublane ranges of the packed output slab for the 10 returned features
_FEATURE_ROWS = [(0, 2), (2, 4), (4, 6), (6, 8), (8, 10),
                 (10, 12), (12, 14), (14, 16), (16, 17), (17, 18)]


def nn_forward(x, params, tile_n=2048):
    """Returns the list of 10 features ([N, F] each), matching NN.forward."""
    N = x.shape[0]
    p = pack_params(params)                       # f32[27] -> SMEM
    xt = jnp.asarray(x, jnp.float32).T            # [2, N] lane-dense

    # batch tiling: lane axis must be a multiple of 128
    n_aligned = ((N + 127) // 128) * 128
    tile = min(int(tile_n), n_aligned)
    n_pad = pl.cdiv(N, tile) * tile
    xt = jnp.pad(xt, ((0, 0), (0, n_pad - N)))

    out = pl.pallas_call(
        mlp_kernel,
        out_shape=jax.ShapeDtypeStruct((18, n_pad), jnp.float32),
        grid_spec=pltpu.PrefetchScalarGridSpec(
            num_scalar_prefetch=0,
            grid=(n_pad // tile,),
            in_specs=[
                pl.BlockSpec(memory_space=pltpu.MemorySpace.SMEM),     # params
                pl.BlockSpec((2, tile), lambda i: (0, i)),             # x tile
            ],
            out_specs=pl.BlockSpec((18, tile), lambda i: (0, i)),      # packed slab
        ),
        compiler_params=pltpu.CompilerParams(
            dimension_semantics=("parallel",),
        ),
    )(p, xt)

    out = out[:, :N]                              # drop batch padding
    return [out[r0:r1, :].T for (r0, r1) in _FEATURE_ROWS]


def init_params(key):
    """Deterministic init mimicking torch.nn.Linear default (uniform +-1/sqrt(fan_in))."""
    dims = [(2, 2), (2, 2), (2, 2), (2, 2), (2, 1)]   # (in, out) per layer
    params = []
    for (fan_in, fan_out) in dims:
        key, kw, kb = jax.random.split(key, 3)
        bound = 1.0 / jnp.sqrt(float(fan_in))
        w = jax.random.uniform(kw, (fan_in, fan_out), jnp.float32, -bound, bound)
        b = jax.random.uniform(kb, (fan_out,), jnp.float32, -bound, bound)
        params.append((w, b))
    return params


def reference_forward(x, params):
    feats = []
    h = jnp.asarray(x, jnp.float32)
    for (w, b) in params:
        z = h @ w + b
        feats.append(z)
        h = jax.nn.sigmoid(z)
        feats.append(h)
    return feats


def _check(x, params, tile_n):
    feats = jax.block_until_ready(nn_forward(x, params, tile_n=tile_n))
    ref = reference_forward(x, params)
    for f, r in zip(feats, ref):
        assert f.shape == r.shape, (f.shape, r.shape)
        assert jnp.max(jnp.abs(f - r)) < 1e-5


if __name__ == "__main__":
    key = jax.random.PRNGKey(0)
    key, kx1, kx2 = jax.random.split(key, 3)
    params = init_params(key)

    # small batch (single tile / single grid step)
    x_small = jax.random.normal(kx1, (8, 2), dtype=jnp.float32)
    _check(x_small, params, tile_n=2048)

    # non-multiple-of-128 batch with a multi-step grid (exercises padding + pipeline)
    x_big = jax.random.normal(kx2, (300, 2), dtype=jnp.float32)
    _check(x_big, params, tile_n=128)

    print("KERNEL_OK")
</pallas_src>

<mosaic_0001>
module attributes {stable_mosaic.version = 11 : i64} {
  func.func @mlp_kernel(%arg0: i32, %arg1: memref<27xf32, #tpu.memory_space<smem>>, %arg2: memref<2x128xf32, #tpu.memory_space<vmem>>, %arg3: memref<18x128xf32, #tpu.memory_space<vmem>>) attributes {dimension_semantics = [#tpu.dimension_semantics<parallel>], iteration_bounds = array<i64: 1>, scalar_prefetch = 0 : i64, scratch_operands = 0 : i64, tpu.core_type = #tpu.core_type<tc>, window_params = [{transform_indices = @transform_0, window_bounds = array<i64: 27>}, {transform_indices = @transform_1, window_bounds = array<i64: 2, 128>}, {transform_indices = @transform_2, window_bounds = array<i64: 18, 128>}]} {
    %c0 = arith.constant 0 : index
    %c0_0 = arith.constant 0 : index
    %0 = vector.load %arg2[%c0, %c0_0] : memref<2x128xf32, #tpu.memory_space<vmem>>, vector<1x128xf32>
    %c1 = arith.constant 1 : index
    %c0_1 = arith.constant 0 : index
    %1 = vector.load %arg2[%c1, %c0_1] : memref<2x128xf32, #tpu.memory_space<vmem>>, vector<1x128xf32>
    %c0_2 = arith.constant 0 : index
    %2 = memref.load %arg1[%c0_2] : memref<27xf32, #tpu.memory_space<smem>>
    %c1_3 = arith.constant 1 : index
    %3 = memref.load %arg1[%c1_3] : memref<27xf32, #tpu.memory_space<smem>>
    %c2 = arith.constant 2 : index
    %4 = memref.load %arg1[%c2] : memref<27xf32, #tpu.memory_space<smem>>
    %c3 = arith.constant 3 : index
    %5 = memref.load %arg1[%c3] : memref<27xf32, #tpu.memory_space<smem>>
    %c4 = arith.constant 4 : index
    %6 = memref.load %arg1[%c4] : memref<27xf32, #tpu.memory_space<smem>>
    %c5 = arith.constant 5 : index
    %7 = memref.load %arg1[%c5] : memref<27xf32, #tpu.memory_space<smem>>
    %8 = vector.broadcast %2 : f32 to vector<1x128xf32>
    %9 = arith.mulf %0, %8 : vector<1x128xf32>
    %10 = vector.broadcast %4 : f32 to vector<1x128xf32>
    %11 = arith.mulf %1, %10 : vector<1x128xf32>
    %12 = arith.addf %9, %11 : vector<1x128xf32>
    %13 = vector.broadcast %6 : f32 to vector<1x128xf32>
    %14 = arith.addf %12, %13 : vector<1x128xf32>
    %15 = vector.broadcast %3 : f32 to vector<1x128xf32>
    %16 = arith.mulf %0, %15 : vector<1x128xf32>
    %17 = vector.broadcast %5 : f32 to vector<1x128xf32>
    %18 = arith.mulf %1, %17 : vector<1x128xf32>
    %19 = arith.addf %16, %18 : vector<1x128xf32>
    %20 = vector.broadcast %7 : f32 to vector<1x128xf32>
    %21 = arith.addf %19, %20 : vector<1x128xf32>
    %c0_4 = arith.constant 0 : index
    %c0_5 = arith.constant 0 : index
    %22 = vector.load %arg3[%c0_4, %c0_5] : memref<18x128xf32, #tpu.memory_space<vmem>>, vector<1x128xf32>
    tpu.vector_store %arg3[%c0_4, %c0_5], %14 {strides = array<i32>} : memref<18x128xf32, #tpu.memory_space<vmem>>, vector<1x128xf32>,
    %c1_6 = arith.constant 1 : index
    %c0_7 = arith.constant 0 : index
    %23 = vector.load %arg3[%c1_6, %c0_7] : memref<18x128xf32, #tpu.memory_space<vmem>>, vector<1x128xf32>
    tpu.vector_store %arg3[%c1_6, %c0_7], %21 {strides = array<i32>} : memref<18x128xf32, #tpu.memory_space<vmem>>, vector<1x128xf32>,
    %24 = arith.negf %14 : vector<1x128xf32>
    %25 = math.exp %24 : vector<1x128xf32>
    %cst = arith.constant 1.000000e+00 : f32
    %26 = vector.broadcast %cst : f32 to vector<1x128xf32>
    %27 = arith.addf %26, %25 : vector<1x128xf32>
    %28 = arith.divf %26, %27 : vector<1x128xf32>
    %29 = arith.negf %21 : vector<1x128xf32>
    %30 = math.exp %29 : vector<1x128xf32>
    %cst_8 = arith.constant 1.000000e+00 : f32
    %31 = vector.broadcast %cst_8 : f32 to vector<1x128xf32>
    %32 = arith.addf %31, %30 : vector<1x128xf32>
    %33 = arith.divf %31, %32 : vector<1x128xf32>
    %c2_9 = arith.constant 2 : index
    %c0_10 = arith.constant 0 : index
    %34 = vector.load %arg3[%c2_9, %c0_10] : memref<18x128xf32, #tpu.memory_space<vmem>>, vector<1x128xf32>
    tpu.vector_store %arg3[%c2_9, %c0_10], %28 {strides = array<i32>} : memref<18x128xf32, #tpu.memory_space<vmem>>, vector<1x128xf32>,
    %c3_11 = arith.constant 3 : index
    %c0_12 = arith.constant 0 : index
    %35 = vector.load %arg3[%c3_11, %c0_12] : memref<18x128xf32, #tpu.memory_space<vmem>>, vector<1x128xf32>
    tpu.vector_store %arg3[%c3_11, %c0_12], %33 {strides = array<i32>} : memref<18x128xf32, #tpu.memory_space<vmem>>, vector<1x128xf32>,
    %c6 = arith.constant 6 : index
    %36 = memref.load %arg1[%c6] : memref<27xf32, #tpu.memory_space<smem>>
    %c7 = arith.constant 7 : index
    %37 = memref.load %arg1[%c7] : memref<27xf32, #tpu.memory_space<smem>>
    %c8 = arith.constant 8 : index
    %38 = memref.load %arg1[%c8] : memref<27xf32, #tpu.memory_space<smem>>
    %c9 = arith.constant 9 : index
    %39 = memref.load %arg1[%c9] : memref<27xf32, #tpu.memory_space<smem>>
    %c10 = arith.constant 10 : index
    %40 = memref.load %arg1[%c10] : memref<27xf32, #tpu.memory_space<smem>>
    %c11 = arith.constant 11 : index
    %41 = memref.load %arg1[%c11] : memref<27xf32, #tpu.memory_space<smem>>
    %42 = vector.broadcast %36 : f32 to vector<1x128xf32>
    %43 = arith.mulf %28, %42 : vector<1x128xf32>
    %44 = vector.broadcast %38 : f32 to vector<1x128xf32>
    %45 = arith.mulf %33, %44 : vector<1x128xf32>
    %46 = arith.addf %43, %45 : vector<1x128xf32>
    %47 = vector.broadcast %40 : f32 to vector<1x128xf32>
    %48 = arith.addf %46, %47 : vector<1x128xf32>
    %49 = vector.broadcast %37 : f32 to vector<1x128xf32>
    %50 = arith.mulf %28, %49 : vector<1x128xf32>
    %51 = vector.broadcast %39 : f32 to vector<1x128xf32>
    %52 = arith.mulf %33, %51 : vector<1x128xf32>
    %53 = arith.addf %50, %52 : vector<1x128xf32>
    %54 = vector.broadcast %41 : f32 to vector<1x128xf32>
    %55 = arith.addf %53, %54 : vector<1x128xf32>
    %c4_13 = arith.constant 4 : index
    %c0_14 = arith.constant 0 : index
    %56 = vector.load %arg3[%c4_13, %c0_14] : memref<18x128xf32, #tpu.memory_space<vmem>>, vector<1x128xf32>
    tpu.vector_store %arg3[%c4_13, %c0_14], %48 {strides = array<i32>} : memref<18x128xf32, #tpu.memory_space<vmem>>, vector<1x128xf32>,
    %c5_15 = arith.constant 5 : index
    %c0_16 = arith.constant 0 : index
    %57 = vector.load %arg3[%c5_15, %c0_16] : memref<18x128xf32, #tpu.memory_space<vmem>>, vector<1x128xf32>
    tpu.vector_store %arg3[%c5_15, %c0_16], %55 {strides = array<i32>} : memref<18x128xf32, #tpu.memory_space<vmem>>, vector<1x128xf32>,
    %58 = arith.negf %48 : vector<1x128xf32>
    %59 = math.exp %58 : vector<1x128xf32>
    %cst_17 = arith.constant 1.000000e+00 : f32
    %60 = vector.broadcast %cst_17 : f32 to vector<1x128xf32>
    %61 = arith.addf %60, %59 : vector<1x128xf32>
    %62 = arith.divf %60, %61 : vector<1x128xf32>
    %63 = arith.negf %55 : vector<1x128xf32>
    %64 = math.exp %63 : vector<1x128xf32>
    %cst_18 = arith.constant 1.000000e+00 : f32
    %65 = vector.broadcast %cst_18 : f32 to vector<1x128xf32>
    %66 = arith.addf %65, %64 : vector<1x128xf32>
    %67 = arith.divf %65, %66 : vector<1x128xf32>
    %c6_19 = arith.constant 6 : index
    %c0_20 = arith.constant 0 : index
    %68 = vector.load %arg3[%c6_19, %c0_20] : memref<18x128xf32, #tpu.memory_space<vmem>>, vector<1x128xf32>
    tpu.vector_store %arg3[%c6_19, %c0_20], %62 {strides = array<i32>} : memref<18x128xf32, #tpu.memory_space<vmem>>, vector<1x128xf32>,
    %c7_21 = arith.constant 7 : index
    %c0_22 = arith.constant 0 : index
    %69 = vector.load %arg3[%c7_21, %c0_22] : memref<18x128xf32, #tpu.memory_space<vmem>>, vector<1x128xf32>
    tpu.vector_store %arg3[%c7_21, %c0_22], %67 {strides = array<i32>} : memref<18x128xf32, #tpu.memory_space<vmem>>, vector<1x128xf32>,
    %c12 = arith.constant 12 : index
    %70 = memref.load %arg1[%c12] : memref<27xf32, #tpu.memory_space<smem>>
    %c13 = arith.constant 13 : index
    %71 = memref.load %arg1[%c13] : memref<27xf32, #tpu.memory_space<smem>>
    %c14 = arith.constant 14 : index
    %72 = memref.load %arg1[%c14] : memref<27xf32, #tpu.memory_space<smem>>
    %c15 = arith.constant 15 : index
    %73 = memref.load %arg1[%c15] : memref<27xf32, #tpu.memory_space<smem>>
    %c16 = arith.constant 16 : index
    %74 = memref.load %arg1[%c16] : memref<27xf32, #tpu.memory_space<smem>>
    %c17 = arith.constant 17 : index
    %75 = memref.load %arg1[%c17] : memref<27xf32, #tpu.memory_space<smem>>
    %76 = vector.broadcast %70 : f32 to vector<1x128xf32>
    %77 = arith.mulf %62, %76 : vector<1x128xf32>
    %78 = vector.broadcast %72 : f32 to vector<1x128xf32>
    %79 = arith.mulf %67, %78 : vector<1x128xf32>
    %80 = arith.addf %77, %79 : vector<1x128xf32>
    %81 = vector.broadcast %74 : f32 to vector<1x128xf32>
    %82 = arith.addf %80, %81 : vector<1x128xf32>
    %83 = vector.broadcast %71 : f32 to vector<1x128xf32>
    %84 = arith.mulf %62, %83 : vector<1x128xf32>
    %85 = vector.broadcast %73 : f32 to vector<1x128xf32>
    %86 = arith.mulf %67, %85 : vector<1x128xf32>
    %87 = arith.addf %84, %86 : vector<1x128xf32>
    %88 = vector.broadcast %75 : f32 to vector<1x128xf32>
    %89 = arith.addf %87, %88 : vector<1x128xf32>
    %c8_23 = arith.constant 8 : index
    %c0_24 = arith.constant 0 : index
    %90 = vector.load %arg3[%c8_23, %c0_24] : memref<18x128xf32, #tpu.memory_space<vmem>>, vector<1x128xf32>
    tpu.vector_store %arg3[%c8_23, %c0_24], %82 {strides = array<i32>} : memref<18x128xf32, #tpu.memory_space<vmem>>, vector<1x128xf32>,
    %c9_25 = arith.constant 9 : index
    %c0_26 = arith.constant 0 : index
    %91 = vector.load %arg3[%c9_25, %c0_26] : memref<18x128xf32, #tpu.memory_space<vmem>>, vector<1x128xf32>
    tpu.vector_store %arg3[%c9_25, %c0_26], %89 {strides = array<i32>} : memref<18x128xf32, #tpu.memory_space<vmem>>, vector<1x128xf32>,
    %92 = arith.negf %82 : vector<1x128xf32>
    %93 = math.exp %92 : vector<1x128xf32>
    %cst_27 = arith.constant 1.000000e+00 : f32
    %94 = vector.broadcast %cst_27 : f32 to vector<1x128xf32>
    %95 = arith.addf %94, %93 : vector<1x128xf32>
    %96 = arith.divf %94, %95 : vector<1x128xf32>
    %97 = arith.negf %89 : vector<1x128xf32>
    %98 = math.exp %97 : vector<1x128xf32>
    %cst_28 = arith.constant 1.000000e+00 : f32
    %99 = vector.broadcast %cst_28 : f32 to vector<1x128xf32>
    %100 = arith.addf %99, %98 : vector<1x128xf32>
    %101 = arith.divf %99, %100 : vector<1x128xf32>
    %c10_29 = arith.constant 10 : index
    %c0_30 = arith.constant 0 : index
    %102 = vector.load %arg3[%c10_29, %c0_30] : memref<18x128xf32, #tpu.memory_space<vmem>>, vector<1x128xf32>
    tpu.vector_store %arg3[%c10_29, %c0_30], %96 {strides = array<i32>} : memref<18x128xf32, #tpu.memory_space<vmem>>, vector<1x128xf32>,
    %c11_31 = arith.constant 11 : index
    %c0_32 = arith.constant 0 : index
    %103 = vector.load %arg3[%c11_31, %c0_32] : memref<18x128xf32, #tpu.memory_space<vmem>>, vector<1x128xf32>
    tpu.vector_store %arg3[%c11_31, %c0_32], %101 {strides = array<i32>} : memref<18x128xf32, #tpu.memory_space<vmem>>, vector<1x128xf32>,
    %c18 = arith.constant 18 : index
    %104 = memref.load %arg1[%c18] : memref<27xf32, #tpu.memory_space<smem>>
    %c19 = arith.constant 19 : index
    %105 = memref.load %arg1[%c19] : memref<27xf32, #tpu.memory_space<smem>>
    %c20 = arith.constant 20 : index
    %106 = memref.load %arg1[%c20] : memref<27xf32, #tpu.memory_space<smem>>
    %c21 = arith.constant 21 : index
    %107 = memref.load %arg1[%c21] : memref<27xf32, #tpu.memory_space<smem>>
    %c22 = arith.constant 22 : index
    %108 = memref.load %arg1[%c22] : memref<27xf32, #tpu.memory_space<smem>>
    %c23 = arith.constant 23 : index
    %109 = memref.load %arg1[%c23] : memref<27xf32, #tpu.memory_space<smem>>
    %110 = vector.broadcast %104 : f32 to vector<1x128xf32>
    %111 = arith.mulf %96, %110 : vector<1x128xf32>
    %112 = vector.broadcast %106 : f32 to vector<1x128xf32>
    %113 = arith.mulf %101, %112 : vector<1x128xf32>
    %114 = arith.addf %111, %113 : vector<1x128xf32>
    %115 = vector.broadcast %108 : f32 to vector<1x128xf32>
    %116 = arith.addf %114, %115 : vector<1x128xf32>
    %117 = vector.broadcast %105 : f32 to vector<1x128xf32>
    %118 = arith.mulf %96, %117 : vector<1x128xf32>
    %119 = vector.broadcast %107 : f32 to vector<1x128xf32>
    %120 = arith.mulf %101, %119 : vector<1x128xf32>
    %121 = arith.addf %118, %120 : vector<1x128xf32>
    %122 = vector.broadcast %109 : f32 to vector<1x128xf32>
    %123 = arith.addf %121, %122 : vector<1x128xf32>
    %c12_33 = arith.constant 12 : index
    %c0_34 = arith.constant 0 : index
    %124 = vector.load %arg3[%c12_33, %c0_34] : memref<18x128xf32, #tpu.memory_space<vmem>>, vector<1x128xf32>
    tpu.vector_store %arg3[%c12_33, %c0_34], %116 {strides = array<i32>} : memref<18x128xf32, #tpu.memory_space<vmem>>, vector<1x128xf32>,
    %c13_35 = arith.constant 13 : index
    %c0_36 = arith.constant 0 : index
    %125 = vector.load %arg3[%c13_35, %c0_36] : memref<18x128xf32, #tpu.memory_space<vmem>>, vector<1x128xf32>
    tpu.vector_store %arg3[%c13_35, %c0_36], %123 {strides = array<i32>} : memref<18x128xf32, #tpu.memory_space<vmem>>, vector<1x128xf32>,
    %126 = arith.negf %116 : vector<1x128xf32>
    %127 = math.exp %126 : vector<1x128xf32>
    %cst_37 = arith.constant 1.000000e+00 : f32
    %128 = vector.broadcast %cst_37 : f32 to vector<1x128xf32>
    %129 = arith.addf %128, %127 : vector<1x128xf32>
    %130 = arith.divf %128, %129 : vector<1x128xf32>
    %131 = arith.negf %123 : vector<1x128xf32>
    %132 = math.exp %131 : vector<1x128xf32>
    %cst_38 = arith.constant 1.000000e+00 : f32
    %133 = vector.broadcast %cst_38 : f32 to vector<1x128xf32>
    %134 = arith.addf %133, %132 : vector<1x128xf32>
    %135 = arith.divf %133, %134 : vector<1x128xf32>
    %c14_39 = arith.constant 14 : index
    %c0_40 = arith.constant 0 : index
    %136 = vector.load %arg3[%c14_39, %c0_40] : memref<18x128xf32, #tpu.memory_space<vmem>>, vector<1x128xf32>
    tpu.vector_store %arg3[%c14_39, %c0_40], %130 {strides = array<i32>} : memref<18x128xf32, #tpu.memory_space<vmem>>, vector<1x128xf32>,
    %c15_41 = arith.constant 15 : index
    %c0_42 = arith.constant 0 : index
    %137 = vector.load %arg3[%c15_41, %c0_42] : memref<18x128xf32, #tpu.memory_space<vmem>>, vector<1x128xf32>
    tpu.vector_store %arg3[%c15_41, %c0_42], %135 {strides = array<i32>} : memref<18x128xf32, #tpu.memory_space<vmem>>, vector<1x128xf32>,
    %c24 = arith.constant 24 : index
    %138 = memref.load %arg1[%c24] : memref<27xf32, #tpu.memory_space<smem>>
    %c25 = arith.constant 25 : index
    %139 = memref.load %arg1[%c25] : memref<27xf32, #tpu.memory_space<smem>>
    %c26 = arith.constant 26 : index
    %140 = memref.load %arg1[%c26] : memref<27xf32, #tpu.memory_space<smem>>
    %141 = vector.broadcast %138 : f32 to vector<1x128xf32>
    %142 = arith.mulf %130, %141 : vector<1x128xf32>
    %143 = vector.broadcast %139 : f32 to vector<1x128xf32>
    %144 = arith.mulf %135, %143 : vector<1x128xf32>
    %145 = arith.addf %142, %144 : vector<1x128xf32>
    %146 = vector.broadcast %140 : f32 to vector<1x128xf32>
    %147 = arith.addf %145, %146 : vector<1x128xf32>
    %c16_43 = arith.constant 16 : index
    %c0_44 = arith.constant 0 : index
    %148 = vector.load %arg3[%c16_43, %c0_44] : memref<18x128xf32, #tpu.memory_space<vmem>>, vector<1x128xf32>
    tpu.vector_store %arg3[%c16_43, %c0_44], %147 {strides = array<i32>} : memref<18x128xf32, #tpu.memory_space<vmem>>, vector<1x128xf32>,
    %149 = arith.negf %147 : vector<1x128xf32>
    %150 = math.exp %149 : vector<1x128xf32>
    %cst_45 = arith.constant 1.000000e+00 : f32
    %151 = vector.broadcast %cst_45 : f32 to vector<1x128xf32>
    %152 = arith.addf %151, %150 : vector<1x128xf32>
    %153 = arith.divf %151, %152 : vector<1x128xf32>
    %c17_46 = arith.constant 17 : index
    %c0_47 = arith.constant 0 : index
    %154 = vector.load %arg3[%c17_46, %c0_47] : memref<18x128xf32, #tpu.memory_space<vmem>>, vector<1x128xf32>
    tpu.vector_store %arg3[%c17_46, %c0_47], %153 {strides = array<i32>} : memref<18x128xf32, #tpu.memory_space<vmem>>, vector<1x128xf32>,
    return
  }
  func.func @transform_0(%arg0: i32) -> i32 {
    %c0_i32 = arith.constant 0 : i32
    %c0_i32_0 = arith.constant 0 : i32
    return %c0_i32 : i32
  }
  func.func @transform_1(%arg0: i32) -> (i32, i32) {
    %c0_i32 = arith.constant 0 : i32
    %c0_i32_0 = arith.constant 0 : i32
    return %c0_i32, %arg0 : i32, i32
  }
  func.func @transform_2(%arg0: i32) -> (i32, i32) {
    %c0_i32 = arith.constant 0 : i32
    %c0_i32_0 = arith.constant 0 : i32
    return %c0_i32, %arg0 : i32, i32
  }
}

</mosaic_0001>

<bundles_post_ra>
// kernel: tpu_custom_call.1
= control target key start
LH: loop header
LB: loop body
LE: loop exit
PB: predicated region body
PF: predicated region fallthrough
CT: control target
= control target key end

     0   :  { %7 = vsyncpa [#allocation5], 0  ;;  %s376_s0 = inlined_call_operand.hbm [shape: f32[27], index: 0, kind: input, shape index: {}]   ;;  %s377_s1 = inlined_call_operand.hbm [shape: f32[2,128], index: 1, kind: input, shape index: {}]   ;;  %s378_s2 = inlined_call_operand.hbm [shape: f32[18,128], index: 2, kind: output, shape index: {}]  }
   0x1   :  { %8 = vsyncpa [#allocation3], 0 }
   0x2   :  { %9 = vsyncpa [#allocation4], 0  ;;  %s347_s9 = smov [#allocation2]   ;;  %s348_s12 = smov [#allocation6]  }
   0x3   :  { %17 = dma.hbm_to_smem %s376_s0, 16, %s347_s9, [#allocation5]  }
   0x4   :  { %s24_s13 = sshll.u32 %s348_s12, 4  ;;  %s25_s13 = int_to_ptr.vmem [resolvable:$true] %s24_s13 }
   0x5   :  { %s309_s14 = scalar_lea.vmem %s25_s13, 32  ;;  %p314_p1 = scmp.lt.s32.totalorder %s25_s13, %s25_s13 }
   0x6   :  { %p310_p0 = scmp.ne.s32.totalorder %s25_s13, %s309_s14  ;;  %p315_p2 = scmp.lt.s32.totalorder %s309_s14, %s309_s14 }
   0x8   :  { %p316_p3 = por %p315_p2, %p314_p1 }
   0xa   :  { %p317_p4 = pnand %p316_p3, %p310_p0 }
   0xc   :  { %320 = shalt.err (!%p317_p4)
}
   0xd   :  { %27 = dma.hbm_to_vmem [thread:$0]  %s377_s1, 32, %s25_s13, [#allocation3]  }
   0xe   :  { %341 = dma.done.wait [#allocation5], 16  }
   0xf   :  { %342 = vsyncadd [#allocation5], 4294967280 }
  0x10   :  { %343 = dma.done.wait [#allocation3], 32  }
  0x11   :  { %344 = vsyncadd [#allocation3], 4294967264 }
  0x12   :  { %34 = sfence }
  0x13   :  { %s37_s0 = sld [smem:[#allocation2]]  ;;  %v35_v0 = vld [vmem:[#allocation6] sm:$0x1]  ;;  %v36_v1 = vld [vmem:[#allocation6 + $0x1] sm:$0x1]  ;;  %s349_s14 = smov [#allocation7]  }
  0x14   :  { %s218_s17 = sld [smem:[#allocation2 + $0x2]]  ;;  %s204_s15 = sshll.u32 %s349_s14, 4  ;;  %s205_s15 = int_to_ptr.vmem [resolvable:$true] %s204_s15 }
  0x15   :  { %s220_s18 = sld [smem:[#allocation2 + $0x4]]  ;;  %s321_s16 = scalar_lea.vmem %s205_s15, 384 }
  0x16   :  { %s217_s19 = sld [smem:[#allocation2 + $0x1]]  ;;  %p322_p5 = scmp.ne.s32.totalorder %s205_s15, %s321_s16 }
  0x17   :  { %s219_s20 = sld [smem:[#allocation2 + $0x3]]  ;;  %p326_p6 = scmp.lt.s32.totalorder %s205_s15, %s205_s15 }
  0x18   :  { %s221_s21 = sld [smem:[#allocation2 + $0x5]]  ;;  %p327_p7 = scmp.lt.s32.totalorder %s321_s16, %s321_s16 }
  0x19   :  { %v43_v2 = vstv %s37_s0  ;;  %s224_s1 = sld [smem:[#allocation2 + $0x6]] }
  0x1a   :  { %v44_v3 = vmul.f32 %v43_v2, %v35_v0  ;;  %v45_v4 = vstv %s218_s17  ;;  %s225_s22 = sld [smem:[#allocation2 + $0x7]]  ;;  %p328_p8 = por %p327_p7, %p326_p6 }
  0x1b   :  { %v46_v5 = vmul.f32 %v45_v4, %v36_v1  ;;  %v48_v6 = vstv %s220_s18  ;;  %s226_s23 = sld [smem:[#allocation2 + $0x8]] }
  0x1c   :  { %v50_v7 = vstv %s217_s19  ;;  %s227_s24 = sld [smem:[#allocation2 + $0x9]]  ;;  %p329_p9 = pnand %p328_p8, %p322_p5 }
  0x1d   :  { %v47_v8 = vadd.f32 %v46_v5, %v44_v3  ;;  %v51_v9 = vmul.f32 %v50_v7, %v35_v0  ;;  %v52_v10 = vstv %s219_s20  ;;  %s228_s25 = sld [smem:[#allocation2 + $0xa]] }
  0x1e   :  { %v53_v11 = vmul.f32 %v52_v10, %v36_v1  ;;  %v55_v13 = vstv %s221_s21  ;;  %s229_s26 = sld [smem:[#allocation2 + $0xb]] }
  0x1f   :  { %v49_v12 = vadd.f32 %v48_v6, %v47_v8  ;;  %v79_v22 = vstv %s224_s1  ;;  %s232_s27 = sld [smem:[#allocation2 + $0xc]] }
  0x20   :  { %v54_v14 = vadd.f32 %v53_v11, %v51_v9  ;;  %v86_v23 = vstv %s225_s22  ;;  %s234_s28 = sld [smem:[#allocation2 + $0xe]] }
  0x21   :  { %57 = vst [vmem:[#allocation7] sm:$0x1] %v49_v12  ;;  %v222_v15 = vmul.f32 -1.442695, %v49_v12  ;;  %v81_v25 = vstv %s226_s23  ;;  %s233_s29 = sld [smem:[#allocation2 + $0xd]] }
  0x22   :  { %v56_v16 = vadd.f32 %v55_v13, %v54_v14  ;;  %v88_v26 = vstv %s227_s24  ;;  %s235_s30 = sld [smem:[#allocation2 + $0xf]] }
  0x23   :  { %257 = vpow2.f32 %v222_v15  ;;  %v84_v32 = vstv %s228_s25  ;;  %s236_s3 = sld [smem:[#allocation2 + $0x10]] }
  0x24   :  { %58 = vst [vmem:[#allocation7 + $0x1] sm:$0x1] %v56_v16  ;;  %v223_v17 = vmul.f32 -1.442695, %v56_v16  ;;  %v91_v33 = vstv %s229_s26  ;;  %s237_s4 = sld [smem:[#allocation2 + $0x11]] }
  0x25   :  { %v115_v44 = vstv %s232_s27  ;;  %s240_s5 = sld [smem:[#allocation2 + $0x12]] }
  0x26   :  { %259 = vpow2.f32 %v223_v17  ;;  %v117_v46 = vstv %s234_s28  ;;  %s242_s6 = sld [smem:[#allocation2 + $0x14]] }
  0x27   :  { %v122_v45 = vstv %s233_s29  ;;  %s241_s7 = sld [smem:[#allocation2 + $0x13]] }
  0x28   :  { %v124_v47 = vstv %s235_s30  ;;  %s243_s8 = sld [smem:[#allocation2 + $0x15]] }
  0x29   :  { %v120_v54 = vstv %s236_s3  ;;  %s244_s9 = sld [smem:[#allocation2 + $0x16]] }
  0x2a   :  { %v127_v55 = vstv %s237_s4  ;;  %s245_s10 = sld [smem:[#allocation2 + $0x17]] }
  0x2b   :  { %v151_v2 = vstv %s240_s5  ;;  %s248_s11 = sld [smem:[#allocation2 + $0x18]] }
  0x2c   :  { %v153_v4 = vstv %s242_s6  ;;  %s249_s12 = sld [smem:[#allocation2 + $0x19]] }
  0x2d   :  { %v158_v3 = vstv %s241_s7  ;;  %s250_s13 = sld [smem:[#allocation2 + $0x1a]] }
  0x2e   :  { %v160_v5 = vstv %s243_s8 }
  0x2f   :  { %v156_v12 = vstv %s244_s9 }
  0x30   :  { %v258_v18 = vpop.eup %257  ;;  %v163_v13 = vstv %s245_s10 }
  0x31   :  { %v62_v19 = vadd.f32 1.0, %v258_v18 }
  0x33   :  { %v260_v20 = vpop.eup %259  ;;  %261 = vrcp.f32 %v62_v19 }
  0x34   :  { %v68_v21 = vadd.f32 1.0, %v260_v20 }
  0x36   :  { %263 = vrcp.f32 %v68_v21 }
  0x40   :  { %v262_v24 = vpop.eup %261 }
  0x41   :  { %71 = vst [vmem:[#allocation7 + $0x2] sm:$0x1] %v262_v24  ;;  %v80_v27 = vmul.f32 %v262_v24, %v79_v22  ;;  %v87_v28 = vmul.f32 %v262_v24, %v86_v23  ;;  %v184_v24 = vstv %s248_s11 }
  0x43   :  { %v264_v29 = vpop.eup %263 }
  0x44   :  { %72 = vst [vmem:[#allocation7 + $0x3] sm:$0x1] %v264_v29  ;;  %v82_v30 = vmul.f32 %v264_v29, %v81_v25  ;;  %v89_v31 = vmul.f32 %v264_v29, %v88_v26  ;;  %v186_v25 = vstv %s249_s12 }
  0x46   :  { %v83_v34 = vadd.f32 %v82_v30, %v80_v27  ;;  %v90_v35 = vadd.f32 %v89_v31, %v87_v28  ;;  %v189_v30 = vstv %s250_s13 }
  0x48   :  { %v85_v36 = vadd.f32 %v84_v32, %v83_v34  ;;  %v92_v37 = vadd.f32 %v91_v33, %v90_v35 }
  0x4a   :  { %93 = vst [vmem:[#allocation7 + $0x4] sm:$0x1] %v85_v36  ;;  %v230_v38 = vmul.f32 -1.442695, %v85_v36  ;;  %94 = vst [vmem:[#allocation7 + $0x5] sm:$0x1] %v92_v37 }
  0x4b   :  { %v231_v39 = vmul.f32 -1.442695, %v92_v37 }
  0x4c   :  { %265 = vpow2.f32 %v230_v38 }
  0x4d   :  { %267 = vpow2.f32 %v231_v39 }
  0x59   :  { %v266_v40 = vpop.eup %265 }
  0x5a   :  { %v268_v41 = vpop.eup %267  ;;  %v98_v42 = vadd.f32 1.0, %v266_v40 }
  0x5b   :  { %v104_v43 = vadd.f32 1.0, %v268_v41 }
  0x5c   :  { %269 = vrcp.f32 %v98_v42 }
  0x5d   :  { %271 = vrcp.f32 %v104_v43 }
  0x69   :  { %v270_v48 = vpop.eup %269 }
  0x6a   :  { %v272_v49 = vpop.eup %271  ;;  %107 = vst [vmem:[#allocation7 + $0x6] sm:$0x1] %v270_v48  ;;  %v116_v50 = vmul.f32 %v270_v48, %v115_v44  ;;  %v123_v51 = vmul.f32 %v270_v48, %v122_v45 }
  0x6b   :  { %108 = vst [vmem:[#allocation7 + $0x7] sm:$0x1] %v272_v49  ;;  %v118_v52 = vmul.f32 %v272_v49, %v117_v46  ;;  %v125_v53 = vmul.f32 %v272_v49, %v124_v47 }
  0x6d   :  { %v119_v56 = vadd.f32 %v118_v52, %v116_v50  ;;  %v126_v57 = vadd.f32 %v125_v53, %v123_v51 }
  0x6f   :  { %v121_v58 = vadd.f32 %v120_v54, %v119_v56  ;;  %v128_v59 = vadd.f32 %v127_v55, %v126_v57 }
  0x71   :  { %129 = vst [vmem:[#allocation7 + $0x8] sm:$0x1] %v121_v58  ;;  %v238_v60 = vmul.f32 -1.442695, %v121_v58  ;;  %130 = vst [vmem:[#allocation7 + $0x9] sm:$0x1] %v128_v59 }
  0x72   :  { %v239_v61 = vmul.f32 -1.442695, %v128_v59 }
  0x73   :  { %273 = vpow2.f32 %v238_v60 }
  0x74   :  { %275 = vpow2.f32 %v239_v61 }
  0x80   :  { %v274_v62 = vpop.eup %273 }
  0x81   :  { %v276_v63 = vpop.eup %275  ;;  %v134_v0 = vadd.f32 1.0, %v274_v62 }
  0x82   :  { %v140_v1 = vadd.f32 1.0, %v276_v63 }
  0x83   :  { %277 = vrcp.f32 %v134_v0 }
  0x84   :  { %279 = vrcp.f32 %v140_v1 }
  0x90   :  { %v278_v6 = vpop.eup %277 }
  0x91   :  { %v280_v7 = vpop.eup %279  ;;  %143 = vst [vmem:[#allocation7 + $0xa] sm:$0x1] %v278_v6  ;;  %v152_v8 = vmul.f32 %v278_v6, %v151_v2  ;;  %v159_v9 = vmul.f32 %v278_v6, %v158_v3 }
  0x92   :  { %144 = vst [vmem:[#allocation7 + $0xb] sm:$0x1] %v280_v7  ;;  %v154_v10 = vmul.f32 %v280_v7, %v153_v4  ;;  %v161_v11 = vmul.f32 %v280_v7, %v160_v5 }
  0x94   :  { %v155_v14 = vadd.f32 %v154_v10, %v152_v8  ;;  %v162_v15 = vadd.f32 %v161_v11, %v159_v9 }
  0x96   :  { %v157_v16 = vadd.f32 %v156_v12, %v155_v14  ;;  %v164_v17 = vadd.f32 %v163_v13, %v162_v15 }
  0x98   :  { %165 = vst [vmem:[#allocation7 + $0xc] sm:$0x1] %v157_v16  ;;  %v246_v18 = vmul.f32 -1.442695, %v157_v16  ;;  %166 = vst [vmem:[#allocation7 + $0xd] sm:$0x1] %v164_v17 }
  0x99   :  { %v247_v19 = vmul.f32 -1.442695, %v164_v17 }
  0x9a   :  { %281 = vpow2.f32 %v246_v18 }
  0x9b   :  { %283 = vpow2.f32 %v247_v19 }
  0xa7   :  { %v282_v20 = vpop.eup %281 }
  0xa8   :  { %v284_v21 = vpop.eup %283  ;;  %v170_v22 = vadd.f32 1.0, %v282_v20 }
  0xa9   :  { %v176_v23 = vadd.f32 1.0, %v284_v21 }
  0xaa   :  { %285 = vrcp.f32 %v170_v22 }
  0xab   :  { %287 = vrcp.f32 %v176_v23 }
  0xb7   :  { %v286_v26 = vpop.eup %285 }
  0xb8   :  { %v288_v27 = vpop.eup %287  ;;  %179 = vst [vmem:[#allocation7 + $0xe] sm:$0x1] %v286_v26  ;;  %v185_v28 = vmul.f32 %v286_v26, %v184_v24 }
  0xb9   :  { %180 = vst [vmem:[#allocation7 + $0xf] sm:$0x1] %v288_v27  ;;  %v187_v29 = vmul.f32 %v288_v27, %v186_v25 }
  0xbb   :  { %v188_v31 = vadd.f32 %v187_v29, %v185_v28 }
  0xbd   :  { %v190_v32 = vadd.f32 %v189_v30, %v188_v31 }
  0xbf   :  { %191 = vst [vmem:[#allocation7 + $0x10] sm:$0x1] %v190_v32  ;;  %v251_v33 = vmul.f32 -1.442695, %v190_v32 }
  0xc1   :  { %289 = vpow2.f32 %v251_v33 }
  0xce   :  { %v290_v34 = vpop.eup %289 }
  0xcf   :  { %v195_v35 = vadd.f32 1.0, %v290_v34 }
  0xd1   :  { %291 = vrcp.f32 %v195_v35 }
  0xde   :  { %v292_v36 = vpop.eup %291 }
  0xdf   :  { %198 = vst [vmem:[#allocation7 + $0x11] sm:$0x1] %v292_v36 }
  0xe0   :  { %332 = shalt.err (!%p329_p9)
}
  0xe1   :  { %s350_s0 = smov 128   ;;  %s351_s17 = smov 8  }
  0xe2   :  { %210 = dma.vmem_to_hbm [thread:$0]  %s205_s15, 384, %s378_s2, [#allocation4], %s350_s0, %s350_s0, %s351_s17  }
  0xe3   :  { %345 = dma.done.wait [#allocation4], 384  }
  0xe4   :  { %346 = vsyncadd [#allocation4], 4294966912 }
  0xe5   :  { %214 = vsyncpa [#allocation3], 1 }
  0xe6   :  { %215 = vsyncpa [#allocation4], 1 }
  0xe7   :  { %216 = vsyncpa [#allocation5], 1 }

</bundles_post_ra>
